<compile_context>
chip_gen: v7x
topology: tpu7x:2x2x1
jax: 0.10.0
libtpu: 0.0.40
codegen_flags: <defaults>
</compile_context>

<pallas_src>
import functools

import jax
import jax.numpy as jnp
from jax.experimental import pallas as pl
from jax.experimental.pallas import tpu as pltpu


def _round_up(x, m):
    return ((x + m - 1) // m) * m


def _largest_tile(dim, max_tile, quantum):
    """Largest multiple of `quantum` that divides `dim` and is <= max_tile."""
    best = quantum
    t = quantum
    limit = min(dim, max_tile)
    while t <= limit:
        if dim % t == 0:
            best = t
        t += quantum
    return best


def _vmem_capacity_bytes():
    try:
        info = pltpu.get_tpu_info()
        cap = getattr(info, "vmem_capacity_bytes", None)
        if cap:
            return int(cap)
    except Exception:
        pass
    return 64 << 20  # conservative default (v7x per-TensorCore VMEM)


# ---------------------------------------------------------------------------
# Kernels
# ---------------------------------------------------------------------------
def _linear_kernel_wres(x_ref, w_ref, b_ref, o_ref, *, op_dtype):
    # Weight-resident path: full K and full O in one shot.
    # x_ref: (tm, F)  w_ref: (F, O)  b_ref: (1, O)  o_ref: (tm, O)
    x = x_ref[...]
    if op_dtype is not None:
        x = x.astype(op_dtype)  # per-tile cast: never re-materializes x in HBM
    acc = jnp.dot(x, w_ref[...], preferred_element_type=jnp.float32)
    o_ref[...] = (acc + b_ref[...].astype(jnp.float32)).astype(o_ref.dtype)


def _linear_kernel_ktiled(x_ref, w_ref, b_ref, o_ref, acc_ref, *, op_dtype):
    # K-tiled path with f32 accumulator scratch.
    # x_ref: (tm, tk)  w_ref: (tk, tn)  b_ref: (1, tn)  o_ref/acc_ref: (tm, tn)
    @pl.when(pl.program_id(2) == 0)
    def _():
        acc_ref[...] = jnp.zeros_like(acc_ref)

    x = x_ref[...]
    if op_dtype is not None:
        x = x.astype(op_dtype)
    acc_ref[...] += jnp.dot(x, w_ref[...], preferred_element_type=jnp.float32)

    @pl.when(pl.program_id(2) == pl.num_programs(2) - 1)
    def _():
        # Bias added once per output tile, outside the hot K loop.
        o_ref[...] = (acc_ref[...] + b_ref[...].astype(jnp.float32)).astype(
            o_ref.dtype
        )


# ---------------------------------------------------------------------------
# Wrapper: y = x2d @ w + b
# ---------------------------------------------------------------------------
def linear_pallas(
    x2d,
    w,
    b,
    *,
    tm_target=2048,
    tn_max=512,
    tk_max=512,
    compute_dtype=None,
    force_ktiled=False,
):
    """y = x2d @ w + b via a Pallas TPU kernel.  x2d: (N, F), w: (F, O), b: (O,)."""
    n, f = x2d.shape
    f_w, o = w.shape
    assert f_w == f, "weight in_features mismatch"
    assert b.shape == (o,), "bias shape mismatch"

    out_dtype = x2d.dtype
    op_dtype = jnp.dtype(compute_dtype) if compute_dtype is not None else None
    kern_cast = op_dtype if (op_dtype is not None and op_dtype != x2d.dtype) else None

    x_bytes = jnp.dtype(x2d.dtype).itemsize
    w_dtype = op_dtype if op_dtype is not None else w.dtype
    w_bytes = jnp.dtype(w_dtype).itemsize
    out_bytes = jnp.dtype(out_dtype).itemsize

    # Cast only the (small) weight in the wrapper; x is cast per-tile in-kernel.
    w_in = w.astype(w_dtype) if w.dtype != w_dtype else w
    b_in = b.reshape(1, o)

    # Generation-aware VMEM budgeting (v7x: 64 MiB/TC, v5e/v6e: 128 MiB).
    vmem_cap = _vmem_capacity_bytes()
    small_vmem = vmem_cap <= (64 << 20)
    wres_budget = (22 << 20) if small_vmem else (56 << 20)
    vmem_limit_cap = (40 << 20) if small_vmem else (96 << 20)

    cost = pl.CostEstimate(
        flops=2 * n * f * o,
        transcendentals=0,
        bytes_accessed=n * f * x_bytes + f * o * w_bytes + n * o * out_bytes,
    )

    # ------------------------------------------------------------------
    # Path decision: keep the whole W (+bias) resident in VMEM?
    # ------------------------------------------------------------------
    w_resident_bytes = 2 * f * o * w_bytes + 2 * o * 4  # double-buffered W + bias
    row_bytes = 2 * (f * x_bytes + o * out_bytes)       # per-row: db x tile + db out tile
    min_rows = min(256, _round_up(n, 8))
    use_wres = (not force_ktiled) and (
        w_resident_bytes + min_rows * row_bytes <= wres_budget
    )

    if use_wres:
        # --- weight-resident streaming path: grid over M only -------------
        tm_fit = max(8, int((wres_budget - w_resident_bytes) // row_bytes))
        tm = max(8, (min(tm_target, tm_fit, _round_up(n, 8)) // 8) * 8)
        # Ensure both TensorCores (v7x megacore) get an M tile when rows allow.
        if pl.cdiv(n, tm) == 1 and n >= 1024:
            tm = _round_up(pl.cdiv(n, 2), 8)
        grid = (pl.cdiv(n, tm),)

        vmem_est = w_resident_bytes + tm * row_bytes
        vmem_limit = int(
            min(max(int(vmem_est * 1.5) + (8 << 20), 16 << 20), vmem_limit_cap)
        )

        kernel = functools.partial(_linear_kernel_wres, op_dtype=kern_cast)
        return pl.pallas_call(
            kernel,
            out_shape=jax.ShapeDtypeStruct((n, o), out_dtype),
            grid_spec=pltpu.PrefetchScalarGridSpec(
                num_scalar_prefetch=0,
                grid=grid,
                in_specs=[
                    # Full-dim last axes: no HBM padding of x, W or b needed.
                    pl.BlockSpec((tm, f), lambda i: (i, 0)),
                    pl.BlockSpec((f, o), lambda i: (0, 0)),   # constant -> resident
                    pl.BlockSpec((1, o), lambda i: (0, 0)),   # constant -> resident
                ],
                out_specs=pl.BlockSpec((tm, o), lambda i: (i, 0)),
            ),
            compiler_params=pltpu.CompilerParams(
                dimension_semantics=("parallel",),
                vmem_limit_bytes=vmem_limit,
            ),
            cost_estimate=cost,
        )(x2d, w_in, b_in)

    # ----------------------------------------------------------------------
    # Fallback: (M, N, K)-tiled matmul with f32 accumulator.
    # K must be exactly covered (padded with zeros if tiled); M/N raggedness
    # is handled by Pallas' masked boundary writes.
    # ----------------------------------------------------------------------
    if f <= 2048:
        # Whole K in a single block (full-dim last axis is always legal);
        # avoids padding x entirely.
        f_pad, tk = f, f
    else:
        f_pad = _round_up(f, 128)
        tk = _largest_tile(f_pad, tk_max, 128)

    if o < 128:
        o_pad, tn = o, o
    else:
        o_pad = _round_up(o, 128)
        tn = _largest_tile(o_pad, tn_max, 128)

    tm = max(8, (min(512, _round_up(n, 8)) // 8) * 8)
    grid = (pl.cdiv(n, tm), o_pad // tn, f_pad // tk)

    # Pad only what correctness requires: x in K (rare: F > 2048 and F % 128),
    # W/b in K and O (cheap, small tensors).
    x_in = x2d
    if f_pad != f:
        x_in = jnp.pad(x2d, ((0, 0), (0, f_pad - f)))
    w_p = w_in
    if (f_pad, o_pad) != (f, o):
        w_p = jnp.pad(w_in, ((0, f_pad - f), (0, o_pad - o)))
    b_p = b_in
    if o_pad != o:
        b_p = jnp.pad(b_in, ((0, 0), (0, o_pad - o)))

    vmem_est = (
        2 * (tm * tk * x_bytes + tk * tn * w_bytes + tm * tn * out_bytes)
        + tm * tn * 4
        + 2 * tn * 4
    )
    vmem_limit = int(
        min(max(int(vmem_est * 1.5) + (8 << 20), 16 << 20), vmem_limit_cap)
    )

    kernel = functools.partial(_linear_kernel_ktiled, op_dtype=kern_cast)
    return pl.pallas_call(
        kernel,
        out_shape=jax.ShapeDtypeStruct((n, o), out_dtype),
        grid_spec=pltpu.PrefetchScalarGridSpec(
            num_scalar_prefetch=0,
            grid=grid,
            in_specs=[
                pl.BlockSpec((tm, tk), lambda i, j, k: (i, k)),
                pl.BlockSpec((tk, tn), lambda i, j, k: (k, j)),
                pl.BlockSpec((1, tn), lambda i, j, k: (0, j)),
            ],
            out_specs=pl.BlockSpec((tm, tn), lambda i, j, k: (i, j)),
            scratch_shapes=[pltpu.VMEM((tm, tn), jnp.float32)],
        ),
        compiler_params=pltpu.CompilerParams(
            dimension_semantics=("parallel", "parallel", "arbitrary"),
            vmem_limit_bytes=vmem_limit,
        ),
        cost_estimate=cost,
    )(x_in, w_p, b_p)


# ---------------------------------------------------------------------------
# TimeDistributed(nn.Linear) forward
# ---------------------------------------------------------------------------
def time_distributed_linear(
    x, w, b, batch_first=False, compute_dtype=None, force_ktiled=False
):
    """Reproduces TimeDistributed(nn.Linear(F, O), batch_first).forward(x).

    x rank <= 2 : plain linear.
    x rank >= 3 : flatten leading dims, apply linear, reshape back:
        batch_first: (x.shape[0], -1, O)   else: (-1, x.shape[1], O)
    """
    kw = dict(compute_dtype=compute_dtype, force_ktiled=force_ktiled)
    if x.ndim <= 2:
        if x.ndim == 1:
            return linear_pallas(x.reshape(1, -1), w, b, **kw).reshape(-1)
        return linear_pallas(x, w, b, **kw)

    feat = x.shape[-1]
    x_flat = x.reshape(-1, feat)          # metadata-only for contiguous leading dims
    y = linear_pallas(x_flat, w, b, **kw)
    out_feat = y.shape[-1]
    if batch_first:
        return y.reshape(x.shape[0], -1, out_feat)
    return y.reshape(-1, x.shape[1], out_feat)


# ---------------------------------------------------------------------------
# Demo / correctness check
# ---------------------------------------------------------------------------
if __name__ == "__main__":
    # Small shapes: batch=2, seq=8, in_features=32, out_features=32.
    B, T, F_IN, F_OUT = 2, 8, 32, 32

    key = jax.random.PRNGKey(0)
    kx, kw_, kb = jax.random.split(key, 3)

    x = jax.random.normal(kx, (B, T, F_IN), dtype=jnp.float32)
    # PyTorch stores W as (out, in); we use the transposed (in, out) layout.
    w = jax.random.normal(kw_, (F_IN, F_OUT), dtype=jnp.float32) * 0.05
    b = jax.random.normal(kb, (F_OUT,), dtype=jnp.float32) * 0.05

    # batch_first=True path (rank-3 input), weight-resident fast path.
    y = jax.block_until_ready(time_distributed_linear(x, w, b, batch_first=True))
    y_ref = (x.reshape(-1, F_IN) @ w + b).reshape(B, -1, F_OUT)
    assert y.shape == (B, T, F_OUT)
    assert jnp.allclose(y, y_ref, atol=1e-5, rtol=1e-5)

    # batch_first=False path (matches PyTorch reshape semantics).
    y2 = jax.block_until_ready(time_distributed_linear(x, w, b, batch_first=False))
    y2_ref = (x.reshape(-1, F_IN) @ w + b).reshape(-1, T, F_OUT)
    assert y2.shape == y2_ref.shape
    assert jnp.allclose(y2, y2_ref, atol=1e-5, rtol=1e-5)

    # rank-2 passthrough path.
    x2d = x.reshape(-1, F_IN)
    y3 = jax.block_until_ready(time_distributed_linear(x2d, w, b))
    assert jnp.allclose(y3, x2d @ w + b, atol=1e-5, rtol=1e-5)

    # Exercise the K-tiled fallback path (F, O not 128-aligned, accumulator kernel).
    F2, O2 = 160, 96
    kx2, kw2, kb2 = jax.random.split(kb, 3)
    xk = jax.random.normal(kx2, (B, T, F2), dtype=jnp.float32)
    wk = jax.random.normal(kw2, (F2, O2), dtype=jnp.float32) * 0.05
    bk = jax.random.normal(kb2, (O2,), dtype=jnp.float32) * 0.05
    y4 = jax.block_until_ready(
        time_distributed_linear(xk, wk, bk, batch_first=True, force_ktiled=True)
    )
    y4_ref = (xk.reshape(-1, F2) @ wk + bk).reshape(B, -1, O2)
    assert jnp.allclose(y4, y4_ref, atol=1e-4, rtol=1e-4)

    # bf16 MXU-operand path (f32 accumulation) — loose tolerance (expected).
    y5 = jax.block_until_ready(
        time_distributed_linear(x, w, b, batch_first=True, compute_dtype=jnp.bfloat16)
    )
    assert jnp.allclose(y5, y_ref, atol=5e-2, rtol=5e-2)

    print("KERNEL_OK")
</pallas_src>

<mosaic_0001>
module attributes {stable_mosaic.version = 11 : i64} {
  func.func @_linear_kernel_wres(%arg0: i32, %arg1: memref<16x32xf32, #tpu.memory_space<vmem>>, %arg2: memref<32x32xf32, #tpu.memory_space<vmem>>, %arg3: memref<1x32xf32, #tpu.memory_space<vmem>>, %arg4: memref<16x32xf32, #tpu.memory_space<vmem>>) attributes {dimension_semantics = [#tpu.dimension_semantics<parallel>], iteration_bounds = array<i64: 1>, scalar_prefetch = 0 : i64, scratch_operands = 0 : i64, tpu.core_type = #tpu.core_type<tc>, window_params = [{transform_indices = @transform_0, window_bounds = array<i64: 16, 32>}, {pipeline_mode = #tpu.pipeline_mode<synchronous>, transform_indices = @transform_1, window_bounds = array<i64: 32, 32>}, {pipeline_mode = #tpu.pipeline_mode<synchronous>, transform_indices = @transform_2, window_bounds = array<i64: 1, 32>}, {transform_indices = @transform_3, window_bounds = array<i64: 16, 32>}]} {
    %c0 = arith.constant 0 : index
    %c0_0 = arith.constant 0 : index
    %0 = vector.load %arg1[%c0, %c0_0] : memref<16x32xf32, #tpu.memory_space<vmem>>, vector<16x32xf32>
    %c0_1 = arith.constant 0 : index
    %c0_2 = arith.constant 0 : index
    %1 = vector.load %arg2[%c0_1, %c0_2] : memref<32x32xf32, #tpu.memory_space<vmem>>, vector<32x32xf32>
    %cst = arith.constant dense<0.000000e+00> : vector<16x32xf32>
    %2 = tpu.matmul %0, %1, %cst {dimension_numbers = #tpu.dot_dimension_numbers<[1], [0], [0], [1], [0, 0, 1, 1], [], []>} : vector<16x32xf32>, vector<32x32xf32>, vector<16x32xf32> -> vector<16x32xf32>
    %c0_3 = arith.constant 0 : index
    %c0_4 = arith.constant 0 : index
    %3 = vector.load %arg3[%c0_3, %c0_4] : memref<1x32xf32, #tpu.memory_space<vmem>>, vector<1x32xf32>
    %4 = vector.broadcast %3 : vector<1x32xf32> to vector<16x32xf32>
    %5 = arith.addf %2, %4 : vector<16x32xf32>
    %c0_5 = arith.constant 0 : index
    %c0_6 = arith.constant 0 : index
    %6 = vector.load %arg4[%c0_5, %c0_6] : memref<16x32xf32, #tpu.memory_space<vmem>>, vector<16x32xf32>
    tpu.vector_store %arg4[%c0_5, %c0_6], %5 {strides = array<i32>} : memref<16x32xf32, #tpu.memory_space<vmem>>, vector<16x32xf32>,
    return
  }
  func.func @transform_0(%arg0: i32) -> (i32, i32) {
    %c0_i32 = arith.constant 0 : i32
    %c0_i32_0 = arith.constant 0 : i32
    return %arg0, %c0_i32 : i32, i32
  }
  func.func @transform_1(%arg0: i32) -> (i32, i32) {
    %c0_i32 = arith.constant 0 : i32
    %c0_i32_0 = arith.constant 0 : i32
    %c0_i32_1 = arith.constant 0 : i32
    return %c0_i32, %c0_i32_0 : i32, i32
  }
  func.func @transform_2(%arg0: i32) -> (i32, i32) {
    %c0_i32 = arith.constant 0 : i32
    %c0_i32_0 = arith.constant 0 : i32
    %c0_i32_1 = arith.constant 0 : i32
    return %c0_i32, %c0_i32_0 : i32, i32
  }
  func.func @transform_3(%arg0: i32) -> (i32, i32) {
    %c0_i32 = arith.constant 0 : i32
    %c0_i32_0 = arith.constant 0 : i32
    return %arg0, %c0_i32 : i32, i32
  }
}

</mosaic_0001>

<bundles_post_ra>
// kernel: tpu_custom_call.1
= control target key start
LH: loop header
LB: loop body
LE: loop exit
PB: predicated region body
PF: predicated region fallthrough
CT: control target
= control target key end

     0   :  { %8 = vsyncpa [#allocation3], 0  ;;  %s340_s0 = inlined_call_operand.hbm [shape: f32[16,32], index: 0, kind: input, shape index: {}]   ;;  %s341_s1 = inlined_call_operand.hbm [shape: f32[32,32], index: 1, kind: input, shape index: {}]   ;;  %s342_s2 = inlined_call_operand.vmem [shape: f32[1,32], index: 2, kind: input, shape index: {}]   ;;  %s343_s3 = inlined_call_operand.hbm [shape: f32[16,32], index: 3, kind: output, shape index: {}]  }
   0x1   :  { %9 = vsyncpa [#allocation6], 0 }
   0x2   :  { %10 = vsyncpa [#allocation4], 0  ;;  %s263_s12 = smov [#allocation2]   ;;  %s191_s16 = scalar_lea.hbm %s340_s0, 256 }
   0x3   :  { %s16_s13 = sshll.u32 %s263_s12, 4  ;;  %p192_p0 = scmp.ne.s32.totalorder %s340_s0, %s191_s16  ;;  %s17_s13 = int_to_ptr.vmem [resolvable:$true] %s16_s13 }
   0x4   :  { %p195_p1 = scmp.lt.u32.totalorder %s191_s16, %s340_s0 }
   0x6   :  { %p197_p2 = pnand %p195_p1, %p192_p0 }
   0x8   :  { %200 = shalt.err (!%p197_p2)
}
   0x9   :  { %s201_s21 = scalar_lea.vmem %s17_s13, 256  ;;  %p206_p4 = scmp.lt.s32.totalorder %s17_s13, %s17_s13 }
   0xa   :  { %p202_p3 = scmp.ne.s32.totalorder %s17_s13, %s201_s21  ;;  %p207_p5 = scmp.lt.s32.totalorder %s201_s21, %s201_s21 }
   0xc   :  { %p208_p6 = por %p207_p5, %p206_p4 }
   0xe   :  { %p209_p7 = pnand %p208_p6, %p202_p3 }
  0x10   :  { %212 = shalt.err (!%p209_p7)
}
  0x11   :  { %s264_s22 = smov 128   ;;  %s265_s23 = smov 8  }
  0x12   :  { %22 = dma.hbm_to_vmem [thread:$0]  %s340_s0, 256, %s17_s13, [#allocation3], %s264_s22, %s264_s22, %s265_s23  }
  0x13   :  { %s266_s26 = smov [#allocation5]   ;;  %s213_s30 = scalar_lea.hbm %s341_s1, 512 }
  0x14   :  { %s28_s27 = sshll.u32 %s266_s26, 4  ;;  %p214_p8 = scmp.ne.s32.totalorder %s341_s1, %s213_s30  ;;  %s29_s27 = int_to_ptr.vmem [resolvable:$true] %s28_s27 }
  0x15   :  { %p217_p9 = scmp.lt.u32.totalorder %s213_s30, %s341_s1 }
  0x17   :  { %p219_p10 = pnand %p217_p9, %p214_p8 }
  0x19   :  { %222 = shalt.err (!%p219_p10)
}
  0x1a   :  { %s223_s8 = scalar_lea.vmem %s29_s27, 512  ;;  %p228_p12 = scmp.lt.s32.totalorder %s29_s27, %s29_s27 }
  0x1b   :  { %p224_p11 = scmp.ne.s32.totalorder %s29_s27, %s223_s8  ;;  %p229_p13 = scmp.lt.s32.totalorder %s223_s8, %s223_s8 }
  0x1d   :  { %p230_p0 = por %p229_p13, %p228_p12 }
  0x1f   :  { %p231_p1 = pnand %p230_p0, %p224_p11 }
  0x21   :  { %234 = shalt.err (!%p231_p1)
}
  0x22   :  { %34 = dma.hbm_to_vmem [thread:$0]  %s341_s1, 512, %s29_s27, [#allocation6], %s264_s22, %s264_s22, %s265_s23  }
  0x23   :  { %257 = dma.done.wait [#allocation3], 256  }
  0x24   :  { %258 = vsyncadd [#allocation3], 4294967040 }
  0x25   :  { %259 = dma.done.wait [#allocation6], 512  }
  0x26   :  { %260 = vsyncadd [#allocation6], 4294966784  ;;  %vm56_vm0 = vcmask 261120   ;;  %v45_v0 = vld [vmem:[#allocation5] sm:$0xff]  ;;  %v46_v1 = vld [vmem:[#allocation5 + $0x8] sm:$0xff]  ;;  %s267_s11 = smov [#allocation7]  }
  0x27   :  { %v47_v2 = vld [vmem:[#allocation5 + $0x10] sm:$0xff]  ;;  %v178_v3 = vpack.c.bf16 %v46_v1, %v45_v0  ;;  %v48_v4 = vld [vmem:[#allocation5 + $0x18] sm:$0xff]  ;;  %s145_s12 = sshll.u32 %s267_s11, 4  ;;  %s146_s12 = int_to_ptr.vmem [resolvable:$true] %s145_s12 }
  0x28   :  { %v43_v5 = vld [vmem:[#allocation2] sm:$0xff]  ;;  %v182_v6 = vpack.c.bf16 %v48_v4, %v47_v2  ;;  %v44_v7 = vld [vmem:[#allocation2 + $0x8] sm:$0xff]  ;;  %s235_s13 = scalar_lea.vmem %s146_s12, 256  ;;  %p240_p3 = scmp.lt.s32.totalorder %s146_s12, %s146_s12 }
  0x29   :  { %175 = vmatprep.mubr.msk.f32.mxu0 %vm56_vm0, %v43_v5  ;;  %179 = vmatprep.subr.bf16.mxu0 %v178_v3  ;;  %v158_v8 = vld [vmem:[%s342_s2] ss:$0 sm:$0xff]  ;;  %p236_p2 = scmp.ne.s32.totalorder %s146_s12, %s235_s13  ;;  %p241_p4 = scmp.lt.s32.totalorder %s235_s13, %s235_s13 }
  0x2a   :  { %181 = vmatpush3.bf16.msra.mxu0 %v178_v3 }
  0x2b   :  { %183 = vmatprep.subr.bf16.mxu0 %v182_v6  ;;  %p242_p5 = por %p241_p4, %p240_p3 }
  0x2d   :  { %p243_p6 = pnand %p242_p5, %p236_p2 }
  0x2e   :  { %185 = vmatpush3.bf16.msra.mxu0 %v182_v6 }
  0x31   :  { %176 = vmatmul.mubr.msk.f32.vlgmr.msra.gmra.mrb[0].mxu0 %vm56_vm0, %v44_v7 }
 0x104   :  { %v177_v9 = vpop.f32.mrb[0].mxu0 }
 0x105   :  { %v135_v10 = vadd.f32 %v177_v9, %v158_v8  ;;  %v129_v11 = vpop.f32.mrb[1].mxu0 }
 0x106   :  { %v130_v12 = vadd.f32 %v158_v8, %v129_v11 }
 0x107   :  { %139 = vst.msk [vmem:[#allocation7 + $0x8] sm:$0xff] %vm56_vm0, %v135_v10 }
 0x108   :  { %138 = vst.msk [vmem:[#allocation7] sm:$0xff] %vm56_vm0, %v130_v12 }
 0x109   :  { %246 = shalt.err (!%p243_p6)
}
 0x10a   :  { %s247_s15 = scalar_lea.hbm %s343_s3, 256 }
 0x10b   :  { %p248_p7 = scmp.ne.s32.totalorder %s343_s3, %s247_s15  ;;  %p251_p8 = scmp.lt.u32.totalorder %s247_s15, %s343_s3 }
 0x10d   :  { %p253_p9 = pnand %p251_p8, %p248_p7 }
 0x10f   :  { %256 = shalt.err (!%p253_p9)
}
 0x110   :  { %151 = dma.vmem_to_hbm [thread:$0]  %s146_s12, 256, %s343_s3, [#allocation4], %s264_s22, %s264_s22, %s265_s23  }
 0x111   :  { %261 = dma.done.wait [#allocation4], 256  }
 0x112   :  { %262 = vsyncadd [#allocation4], 4294967040 }
 0x113   :  { %155 = vsyncpa [#allocation3], 1 }
 0x114   :  { %156 = vsyncpa [#allocation6], 1 }
 0x115   :  { %157 = vsyncpa [#allocation4], 1 }

</bundles_post_ra>
